<compile_context>
chip_gen: v7x
topology: tpu7x:2x2x1
jax: 0.10.0
libtpu: 0.0.40
codegen_flags: <defaults>
</compile_context>

<pallas_src>
import math

import jax
import jax.numpy as jnp
from jax.experimental import pallas as pl
from jax.experimental.pallas import tpu as pltpu


def _layerscale_kernel(x_ref, g_ref, o_ref):
    # x_ref: (TM, TN) activation tile, g_ref: (1, TN) gamma slice in f32.
    x = x_ref[...].astype(jnp.float32)
    o_ref[...] = (x * g_ref[...]).astype(o_ref.dtype)


def _round_up(n: int, m: int) -> int:
    return ((n + m - 1) // m) * m


def layer_scale(x: jax.Array, gamma: jax.Array) -> jax.Array:
    """LayerScale forward: x * gamma, gamma broadcast along the last axis."""
    orig_shape = x.shape
    D = orig_shape[-1]
    assert gamma.shape == (D,), f"gamma must be ({D},), got {gamma.shape}"

    x2d = x.reshape(-1, D)
    R = x2d.shape[0]
    gamma_f32 = gamma.astype(jnp.float32)

    # Lane-dense layout: if D is not a multiple of the 128-lane width, fold
    # `g` consecutive rows into one row of width lcm(D, 128) (gamma tiled g
    # times). Pure reshape on a row-major layout — no data movement semantics
    # change. Falls back to (R, D) if rows don't divide evenly (masked stores
    # are still cheaper than an extra HBM pad/slice pass).
    if D % 128 != 0:
        g = math.lcm(D, 128) // D
        if R % g == 0:
            x2d = x2d.reshape(R // g, g * D)
            gamma_row = jnp.tile(gamma_f32, g).reshape(1, g * D)
        else:
            gamma_row = gamma_f32.reshape(1, D)
    else:
        gamma_row = gamma_f32.reshape(1, D)

    rows, W = x2d.shape
    itemsize = jnp.dtype(x.dtype).itemsize

    # Dtype-aware sublane multiple: 8 rows for f32, 16 for bf16, 32 for int8/fp8.
    sub = max(8, 32 // itemsize)

    # Channel tile: take the full width unless it is very wide, then 2048-lane
    # chunks (multiple of 128) so TM can stay large on wide-channel models.
    MAX_TN = 2048
    TN = W if W <= MAX_TN else MAX_TN

    # Row tile: largest multiple of `sub` keeping the double-buffered (x, out)
    # working set (2 arrays x 2 buffers x TM x TN x itemsize) under ~24 MiB.
    WORKING_SET_BYTES = 24 * 1024 * 1024
    max_tile_elems = WORKING_SET_BYTES // (4 * itemsize)
    TM = (max_tile_elems // TN // sub) * sub
    TM = max(sub, min(TM, 4096, _round_up(rows, sub)))

    grid = (pl.cdiv(rows, TM), pl.cdiv(W, TN))

    out2d = pl.pallas_call(
        _layerscale_kernel,
        out_shape=jax.ShapeDtypeStruct((rows, W), x.dtype),
        grid_spec=pltpu.PrefetchScalarGridSpec(
            num_scalar_prefetch=0,
            grid=grid,
            in_specs=[
                pl.BlockSpec((TM, TN), lambda i, j: (i, j)),
                pl.BlockSpec((1, TN), lambda i, j: (0, j)),  # gamma slice, tiny
            ],
            out_specs=pl.BlockSpec((TM, TN), lambda i, j: (i, j)),
        ),
        compiler_params=pltpu.CompilerParams(
            dimension_semantics=("parallel", "parallel"),
            vmem_limit_bytes=48 * 1024 * 1024,
        ),
    )(x2d, gamma_row)

    return out2d.reshape(orig_shape)


if __name__ == "__main__":
    # Shapes consistent with typical LayerScale usage in attention blocks.
    B, N, D = 2, 8, 32
    init_values = 1e-5

    key = jax.random.PRNGKey(0)
    x = jax.random.normal(key, (B, N, D), dtype=jnp.float32)
    # Matches nn.Parameter(init_values * torch.ones(dim)).
    gamma = init_values * jnp.ones((D,), dtype=jnp.float32)

    out = jax.block_until_ready(layer_scale(x, gamma))
    ref = x * gamma
    assert out.shape == x.shape and out.dtype == x.dtype
    assert jnp.allclose(out, ref, rtol=1e-6, atol=1e-6)

    # Second small case: bf16 activations, D a multiple of 128 (no-fold path),
    # row count not a multiple of the row tile (exercises cdiv + masked block).
    B2, N2, D2 = 3, 5, 384
    x2 = jax.random.normal(jax.random.PRNGKey(1), (B2, N2, D2), dtype=jnp.bfloat16)
    gamma2 = init_values * jnp.ones((D2,), dtype=jnp.float32)
    out2 = jax.block_until_ready(layer_scale(x2, gamma2))
    ref2 = (x2.astype(jnp.float32) * gamma2).astype(jnp.bfloat16)
    assert out2.shape == x2.shape and out2.dtype == x2.dtype
    assert jnp.allclose(out2.astype(jnp.float32), ref2.astype(jnp.float32),
                        rtol=1e-2, atol=1e-8)

    print("KERNEL_OK")
</pallas_src>

<mosaic_0001>
module attributes {stable_mosaic.version = 11 : i64} {
  func.func @_layerscale_kernel(%arg0: i32, %arg1: i32, %arg2: memref<8x128xf32, #tpu.memory_space<vmem>>, %arg3: memref<1x128xf32, #tpu.memory_space<vmem>>, %arg4: memref<8x128xf32, #tpu.memory_space<vmem>>) attributes {dimension_semantics = [#tpu.dimension_semantics<parallel>, #tpu.dimension_semantics<parallel>], iteration_bounds = array<i64: 1, 1>, scalar_prefetch = 0 : i64, scratch_operands = 0 : i64, tpu.core_type = #tpu.core_type<tc>, window_params = [{transform_indices = @transform_0, window_bounds = array<i64: 8, 128>}, {transform_indices = @transform_1, window_bounds = array<i64: 1, 128>}, {transform_indices = @transform_2, window_bounds = array<i64: 8, 128>}]} {
    %c0 = arith.constant 0 : index
    %c0_0 = arith.constant 0 : index
    %0 = vector.load %arg2[%c0, %c0_0] : memref<8x128xf32, #tpu.memory_space<vmem>>, vector<8x128xf32>
    %c0_1 = arith.constant 0 : index
    %c0_2 = arith.constant 0 : index
    %1 = vector.load %arg3[%c0_1, %c0_2] : memref<1x128xf32, #tpu.memory_space<vmem>>, vector<1x128xf32>
    %2 = vector.broadcast %1 : vector<1x128xf32> to vector<8x128xf32>
    %3 = arith.mulf %0, %2 : vector<8x128xf32>
    %c0_3 = arith.constant 0 : index
    %c0_4 = arith.constant 0 : index
    %4 = vector.load %arg4[%c0_3, %c0_4] : memref<8x128xf32, #tpu.memory_space<vmem>>, vector<8x128xf32>
    tpu.vector_store %arg4[%c0_3, %c0_4], %3 {strides = array<i32>} : memref<8x128xf32, #tpu.memory_space<vmem>>, vector<8x128xf32>,
    return
  }
  func.func @transform_0(%arg0: i32, %arg1: i32) -> (i32, i32) {
    %c0_i32 = arith.constant 0 : i32
    return %arg0, %arg1 : i32, i32
  }
  func.func @transform_1(%arg0: i32, %arg1: i32) -> (i32, i32) {
    %c0_i32 = arith.constant 0 : i32
    %c0_i32_0 = arith.constant 0 : i32
    return %c0_i32, %arg1 : i32, i32
  }
  func.func @transform_2(%arg0: i32, %arg1: i32) -> (i32, i32) {
    %c0_i32 = arith.constant 0 : i32
    return %arg0, %arg1 : i32, i32
  }
}

</mosaic_0001>

<bundles_post_ra>
// kernel: tpu_custom_call.1
= control target key start
LH: loop header
LB: loop body
LE: loop exit
PB: predicated region body
PF: predicated region fallthrough
CT: control target
= control target key end

     0   :  { %7 = vsyncpa [#allocation3], 0  ;;  %s152_s0 = inlined_call_operand.hbm [shape: f32[4,128], index: 0, kind: input, shape index: {}]   ;;  %s153_s1 = inlined_call_operand.vmem [shape: f32[1,128], index: 1, kind: input, shape index: {}]   ;;  %s154_s2 = inlined_call_operand.hbm [shape: f32[4,128], index: 2, kind: output, shape index: {}]  }
   0x1   :  { %8 = vsyncpa [#allocation4], 0 }
   0x2   :  { %13 = vsyncadd [#allocation3], 64  ;;  %s106_s9 = smov [#allocation2]   ;;  %s58_s13 = scalar_lea.hbm %s152_s0, 64 }
   0x3   :  { %s14_s10 = sshll.u32 %s106_s9, 4  ;;  %p59_p0 = scmp.ne.s32.totalorder %s152_s0, %s58_s13  ;;  %s15_s10 = int_to_ptr.vmem [resolvable:$true] %s14_s10 }
   0x4   :  { %p62_p1 = scmp.lt.u32.totalorder %s58_s13, %s152_s0 }
   0x6   :  { %p64_p2 = pnand %p62_p1, %p59_p0 }
   0x8   :  { %67 = shalt.err (!%p64_p2)
}
   0x9   :  { %s68_s18 = scalar_lea.vmem %s15_s10, 64  ;;  %s72_s19 = scalar_lea.vmem %s15_s10, 128 }
   0xa   :  { %p69_p3 = scmp.ne.s32.totalorder %s15_s10, %s68_s18  ;;  %p73_p4 = scmp.lt.s32.totalorder %s15_s10, %s15_s10 }
   0xb   :  { %p74_p5 = scmp.lt.s32.totalorder %s72_s19, %s68_s18 }
   0xd   :  { %p75_p6 = por %p74_p5, %p73_p4 }
   0xf   :  { %p76_p7 = pnand %p75_p6, %p69_p3 }
  0x11   :  { %79 = shalt.err (!%p76_p7)
}
  0x12   :  { %s107_s20 = smov 64   ;;  %s108_s21 = smov 4  }
  0x13   :  { %20 = dma.hbm_to_vmem [thread:$0]  %s152_s0, 64, %s15_s10, [#allocation3], %s107_s20, %s107_s20, %s108_s21  }
  0x14   :  { %102 = dma.done.wait [#allocation3], 128  }
  0x15   :  { %103 = vsyncadd [#allocation3], 4294967168  ;;  %v26_v0 = vld [vmem:[#allocation2] sm:$0xff] }
  0x16   :  { %v53_v1 = vld [vmem:[%s153_s1] ss:$0 sm:$0xff] }
  0x17   :  { %v34_v2 = vmul.f32 %v53_v1, %v26_v0 }
  0x19   :  { %35 = vst [vmem:[#allocation5] sm:$0xff] %v34_v2 }
  0x1a   :  { %40 = vsyncadd [#allocation4], 64  ;;  %s109_s26 = smov [#allocation5]  }
  0x1b   :  { %s41_s27 = sshll.u32 %s109_s26, 4  ;;  %s42_s27 = int_to_ptr.vmem [resolvable:$true] %s41_s27 }
  0x1c   :  { %s80_s28 = scalar_lea.vmem %s42_s27, 64  ;;  %s84_s29 = scalar_lea.vmem %s42_s27, 128 }
  0x1d   :  { %p81_p8 = scmp.ne.s32.totalorder %s42_s27, %s80_s28  ;;  %p85_p9 = scmp.lt.s32.totalorder %s42_s27, %s42_s27 }
  0x1e   :  { %p86_p10 = scmp.lt.s32.totalorder %s84_s29, %s80_s28 }
  0x20   :  { %p87_p11 = por %p86_p10, %p85_p9 }
  0x22   :  { %p88_p12 = pnand %p87_p11, %p81_p8 }
  0x24   :  { %91 = shalt.err (!%p88_p12)
}
  0x25   :  { %s92_s3 = scalar_lea.hbm %s154_s2, 64 }
  0x26   :  { %p93_p13 = scmp.ne.s32.totalorder %s154_s2, %s92_s3  ;;  %p96_p0 = scmp.lt.u32.totalorder %s92_s3, %s154_s2 }
  0x28   :  { %p98_p1 = pnand %p96_p0, %p93_p13 }
  0x2a   :  { %101 = shalt.err (!%p98_p1)
}
  0x2b   :  { %47 = dma.vmem_to_hbm [thread:$0]  %s42_s27, 64, %s154_s2, [#allocation4], %s107_s20, %s107_s20, %s108_s21  }
  0x2c   :  { %104 = dma.done.wait [#allocation4], 128  }
  0x2d   :  { %105 = vsyncadd [#allocation4], 4294967168 }
  0x2e   :  { %51 = vsyncpa [#allocation3], 1 }
  0x2f   :  { %52 = vsyncpa [#allocation4], 1 }

</bundles_post_ra>
